<compile_context>
chip_gen: v7x
topology: tpu7x:2x2x1
jax: 0.10.0
libtpu: 0.0.40
codegen_flags: <defaults>
</compile_context>

<pallas_src>
import jax
import jax.numpy as jnp
from jax.experimental import pallas as pl
from jax.experimental.pallas import tpu as pltpu

# ----------------------------- problem sizes --------------------------------
B = 2            # batch
C = 3            # image channels
H = W = 8        # image spatial size
OC = 8           # conv output channels
S = 8            # shelf / inventory size
HID = 32         # hidden width
ACT = 6          # action_dim
K = 3            # conv kernel size
SIZES = [C * H * W, S]       # == module's `sizes`

HP = H + 2                   # padded image height
WPC = (W + 2) * C            # padded-row width in the channels-last 2-D slab
WOC = W * OC                 # conv accumulator lane width (w, oc) interleaved


# --------------------------- fused Pallas kernel -----------------------------
def _make_fused_kernel(batch):
    """Builds the fully-fused kernel for a static batch size."""

    def kernel(pad_ref, shelf_ref,
               wck_ref, bc_ref, w1r_ref, b1_ref,      # conv + img_network linear
               w2_ref, b2_ref,                        # inventory_network linear
               w3a_ref, w3b_ref, b3_ref,              # final linear on concat
               w4_ref, b4_ref,                        # output linear
               o_ref):
        padded = pad_ref[...]                         # (batch*HP, WPC)

        # ---- conv: K banded matmuls over the whole batch row slab ----
        acc = jnp.zeros((batch * H, WOC), jnp.float32)          # [b*H+h, w*OC+oc]
        for kh in range(K):                                     # static python loop
            rows = jnp.concatenate(
                [padded[b * HP + kh: b * HP + kh + H, :] for b in range(batch)],
                axis=0)                                          # (batch*H, WPC)
            acc = acc + jnp.dot(rows, wck_ref[kh],
                                preferred_element_type=jnp.float32)
        conv_all = jnp.maximum(acc + bc_ref[...], 0.0)           # (batch*H, WOC)

        # ---- img_network Linear(H*W*OC -> HID) without an in-kernel reshape:
        # contract row-by-row against w1 reshaped to (H, WOC, HID).
        x_img_rows = []
        for b in range(batch):
            xi = b1_ref[...]                                     # (1, HID)
            for h in range(H):
                xi = xi + jnp.dot(conv_all[b * H + h: b * H + h + 1, :],
                                  w1r_ref[h],
                                  preferred_element_type=jnp.float32)
            x_img_rows.append(jnp.maximum(xi, 0.0))
        x_img = jnp.concatenate(x_img_rows, axis=0)              # (batch, HID)

        # ---- inventory head ----
        x_inv = jnp.maximum(
            jnp.dot(shelf_ref[...], w2_ref[...],
                    preferred_element_type=jnp.float32) + b2_ref[...], 0.0)

        # ---- final MLP: concat(x_img, x_inv) @ W3 == x_img@W3a + x_inv@W3b ----
        hid = jnp.maximum(
            jnp.dot(x_img, w3a_ref[...], preferred_element_type=jnp.float32)
            + jnp.dot(x_inv, w3b_ref[...], preferred_element_type=jnp.float32)
            + b3_ref[...], 0.0)
        logits = (jnp.dot(hid, w4_ref[...], preferred_element_type=jnp.float32)
                  + b4_ref[...])

        # ---- softmax (EUP exp; EXACT divide so probabilities sum to 1) ----
        m = jnp.max(logits, axis=-1, keepdims=True)
        e = jnp.exp(logits - m)
        denom = jnp.sum(e, axis=-1, keepdims=True)
        o_ref[...] = e / denom

    return kernel


def _fused_pallas(pad2d, shelf, wck, bc_row, w1r, b1, w2, b2, w3a, w3b, b3, w4, b4):
    batch = shelf.shape[0]
    args = (pad2d, shelf, wck, bc_row, w1r, b1, w2, b2, w3a, w3b, b3, w4, b4)
    vmem_spec = pl.BlockSpec(memory_space=pltpu.MemorySpace.VMEM)
    return pl.pallas_call(
        _make_fused_kernel(batch),
        out_shape=jax.ShapeDtypeStruct((batch, ACT), jnp.float32),
        in_specs=[vmem_spec] * len(args),
        out_specs=vmem_spec,
    )(*args)


# --------------------------- parameter handling ------------------------------
def init_params(key):
    """Deterministic synthetic parameter init (no checkpoint loading)."""
    ks = jax.random.split(key, 12)

    def w(k, shape, fan_in):
        return (jax.random.normal(k, shape, jnp.float32)
                / jnp.sqrt(fan_in)).astype(jnp.float32)

    wc = w(ks[0], (K, K, C, OC), K * K * C)          # conv weight (kh, kw, cin, cout)
    bc = w(ks[1], (1, OC), 1.0) * 0.1
    w1 = w(ks[2], (H * W * OC, HID), H * W * OC)     # img_network linear
    b1 = w(ks[3], (1, HID), 1.0) * 0.1
    w2 = w(ks[4], (S, HID), S)                       # inventory_network linear
    b2 = w(ks[5], (1, HID), 1.0) * 0.1
    w3a = w(ks[6], (HID, HID), 2 * HID)              # final linear (img half)
    w3b = w(ks[7], (HID, HID), 2 * HID)              # final linear (inventory half)
    b3 = w(ks[8], (1, HID), 1.0) * 0.1
    w4 = w(ks[9], (HID, ACT), HID)                   # output linear
    b4 = w(ks[10], (1, ACT), 1.0) * 0.1
    return dict(wc=wc, bc=bc,
                heads=(w1, b1, w2, b2, w3a, w3b, b3, w4, b4))


def _pack_conv_weight(wc):
    """Repack (K,K,C,OC) conv weight into K banded matrices (K, (W+2)*C, W*OC).

    wck[kh, wp*C + c, w*OC + oc] = wc[kh, wp - w, c, oc] if 0 <= wp-w < K else 0,
    so that padded_rows(kh) @ wck[kh] accumulates the conv output laid out as
    [h, w*OC + oc] — the exact (h, w, oc) flatten order the img Linear expects.
    """
    wp = jnp.arange(W + 2)
    w_out = jnp.arange(W)
    kw = jnp.arange(K)
    band = (wp[None, :, None]
            == (w_out[None, None, :] + kw[:, None, None])).astype(jnp.float32)  # (K, W+2, W)
    wck = jnp.einsum('kpw,hkco->hpcwo', band, wc)       # (K, W+2, C, W, OC)
    return wck.reshape(K, WPC, WOC)


# -------------------------------- forward ------------------------------------
@jax.jit
def forward(obs, params):
    """Forward pass of FoodNetworkMediumPartialObsTask (single fused kernel)."""
    if obs.ndim < 2:
        obs = obs[None, :]
    obs = obs.astype(jnp.float32)
    batch = obs.shape[0]

    # split obs by `sizes` (torch.narrow along dim 1)
    img_flat = obs[:, :SIZES[0]]
    shelf = obs[:, SIZES[0]:SIZES[0] + SIZES[1]]

    # image chunk stored NCHW-flattened; convert to NHWC, SAME-pad, and flatten
    # each padded image to a (HP, WPC) channels-last 2-D slab (rows stacked per batch)
    img = img_flat.reshape(batch, C, H, W).transpose(0, 2, 3, 1)
    padded = jnp.pad(img, ((0, 0), (1, 1), (1, 1), (0, 0)))
    pad2d = padded.reshape(batch * HP, WPC)

    # weight-side repacking (tiny, O(params)) so the conv is dense matmuls in-kernel
    wck = _pack_conv_weight(params["wc"])
    bc_row = jnp.tile(params["bc"], (1, W))            # (1, W*OC): bias at index w*OC+oc
    (w1, b1, w2, b2, w3a, w3b, b3, w4, b4) = params["heads"]
    w1r = w1.reshape(H, WOC, HID)

    return _fused_pallas(pad2d, shelf, wck, bc_row, w1r,
                         b1, w2, b2, w3a, w3b, b3, w4, b4)


# ------------------------------- reference ------------------------------------
def _reference_forward(obs, params):
    """Pure-JAX reference for correctness checking."""
    img_flat = obs[:, :SIZES[0]]
    shelf = obs[:, SIZES[0]:SIZES[0] + SIZES[1]]
    img = img_flat.reshape(obs.shape[0], C, H, W).transpose(0, 2, 3, 1)
    conv = jax.lax.conv_general_dilated(
        img, params["wc"], window_strides=(1, 1), padding="SAME",
        dimension_numbers=("NHWC", "HWIO", "NHWC"))
    conv = jnp.maximum(conv + params["bc"][0], 0.0)
    conv_flat = conv.reshape(obs.shape[0], H * W * OC)
    (w1, b1, w2, b2, w3a, w3b, b3, w4, b4) = params["heads"]
    x_img = jnp.maximum(conv_flat @ w1 + b1, 0.0)
    x_inv = jnp.maximum(shelf @ w2 + b2, 0.0)
    h = jnp.maximum(x_img @ w3a + x_inv @ w3b + b3, 0.0)
    logits = h @ w4 + b4
    return jax.nn.softmax(logits, axis=-1)


if __name__ == "__main__":
    key = jax.random.PRNGKey(0)
    pkey, okey = jax.random.split(key)
    params = init_params(pkey)

    obs = jax.random.uniform(okey, (B, SIZES[0] + SIZES[1]), jnp.float32)

    out = forward(obs, params)
    out = jax.block_until_ready(out)

    ref = _reference_forward(obs, params)
    assert out.shape == (B, ACT), out.shape
    # exact softmax divide -> tight tolerances hold again
    assert jnp.allclose(out, ref, atol=2e-4, rtol=2e-4), (out, ref)
    assert jnp.allclose(jnp.sum(out, axis=-1), 1.0, atol=1e-4)
    assert jnp.all(jnp.argmax(out, axis=-1) == jnp.argmax(ref, axis=-1))

    print("KERNEL_OK")
</pallas_src>

<mosaic_0001>
module attributes {stable_mosaic.version = 11 : i64} {
  func.func @kernel(%arg0: memref<20x30xf32, #tpu.memory_space<vmem>>, %arg1: memref<2x8xf32, #tpu.memory_space<vmem>>, %arg2: memref<3x30x64xf32, #tpu.memory_space<vmem>>, %arg3: memref<1x64xf32, #tpu.memory_space<vmem>>, %arg4: memref<8x64x32xf32, #tpu.memory_space<vmem>>, %arg5: memref<1x32xf32, #tpu.memory_space<vmem>>, %arg6: memref<8x32xf32, #tpu.memory_space<vmem>>, %arg7: memref<1x32xf32, #tpu.memory_space<vmem>>, %arg8: memref<32x32xf32, #tpu.memory_space<vmem>>, %arg9: memref<32x32xf32, #tpu.memory_space<vmem>>, %arg10: memref<1x32xf32, #tpu.memory_space<vmem>>, %arg11: memref<32x6xf32, #tpu.memory_space<vmem>>, %arg12: memref<1x6xf32, #tpu.memory_space<vmem>>, %arg13: memref<2x6xf32, #tpu.memory_space<vmem>>) attributes {dimension_semantics = [], scalar_prefetch = 0 : i64, scratch_operands = 0 : i64, tpu.core_type = #tpu.core_type<tc>} {
    %c0 = arith.constant 0 : index
    %c0_0 = arith.constant 0 : index
    %0 = vector.load %arg0[%c0, %c0_0] : memref<20x30xf32, #tpu.memory_space<vmem>>, vector<20x30xf32>
    %cst = arith.constant 0.000000e+00 : f32
    %1 = vector.broadcast %cst : f32 to vector<16x64xf32>
    %2 = vector.extract_strided_slice %0 {offsets = [0, 0], sizes = [8, 30], strides = [1, 1]} : vector<20x30xf32> to vector<8x30xf32>
    %3 = vector.extract_strided_slice %0 {offsets = [10, 0], sizes = [8, 30], strides = [1, 1]} : vector<20x30xf32> to vector<8x30xf32>
    %4 = tpu.concatenate %2, %3 in 0 : vector<8x30xf32>, vector<8x30xf32> -> vector<16x30xf32>
    %c0_1 = arith.constant 0 : index
    %c0_2 = arith.constant 0 : index
    %c0_3 = arith.constant 0 : index
    %5 = vector.load %arg2[%c0_1, %c0_2, %c0_3] : memref<3x30x64xf32, #tpu.memory_space<vmem>>, vector<1x30x64xf32>
    %6 = vector.shape_cast %5 : vector<1x30x64xf32> to vector<30x64xf32>
    %cst_4 = arith.constant dense<0.000000e+00> : vector<16x64xf32>
    %7 = tpu.matmul %4, %6, %cst_4 {dimension_numbers = #tpu.dot_dimension_numbers<[1], [0], [0], [1], [0, 0, 1, 1], [], []>} : vector<16x30xf32>, vector<30x64xf32>, vector<16x64xf32> -> vector<16x64xf32>
    %8 = arith.addf %1, %7 : vector<16x64xf32>
    %9 = vector.extract_strided_slice %0 {offsets = [1, 0], sizes = [8, 30], strides = [1, 1]} : vector<20x30xf32> to vector<8x30xf32>
    %10 = vector.extract_strided_slice %0 {offsets = [11, 0], sizes = [8, 30], strides = [1, 1]} : vector<20x30xf32> to vector<8x30xf32>
    %11 = tpu.concatenate %9, %10 in 0 : vector<8x30xf32>, vector<8x30xf32> -> vector<16x30xf32>
    %c1 = arith.constant 1 : index
    %c0_5 = arith.constant 0 : index
    %c0_6 = arith.constant 0 : index
    %12 = vector.load %arg2[%c1, %c0_5, %c0_6] : memref<3x30x64xf32, #tpu.memory_space<vmem>>, vector<1x30x64xf32>
    %13 = vector.shape_cast %12 : vector<1x30x64xf32> to vector<30x64xf32>
    %cst_7 = arith.constant dense<0.000000e+00> : vector<16x64xf32>
    %14 = tpu.matmul %11, %13, %cst_7 {dimension_numbers = #tpu.dot_dimension_numbers<[1], [0], [0], [1], [0, 0, 1, 1], [], []>} : vector<16x30xf32>, vector<30x64xf32>, vector<16x64xf32> -> vector<16x64xf32>
    %15 = arith.addf %8, %14 : vector<16x64xf32>
    %16 = vector.extract_strided_slice %0 {offsets = [2, 0], sizes = [8, 30], strides = [1, 1]} : vector<20x30xf32> to vector<8x30xf32>
    %17 = vector.extract_strided_slice %0 {offsets = [12, 0], sizes = [8, 30], strides = [1, 1]} : vector<20x30xf32> to vector<8x30xf32>
    %18 = tpu.concatenate %16, %17 in 0 : vector<8x30xf32>, vector<8x30xf32> -> vector<16x30xf32>
    %c2 = arith.constant 2 : index
    %c0_8 = arith.constant 0 : index
    %c0_9 = arith.constant 0 : index
    %19 = vector.load %arg2[%c2, %c0_8, %c0_9] : memref<3x30x64xf32, #tpu.memory_space<vmem>>, vector<1x30x64xf32>
    %20 = vector.shape_cast %19 : vector<1x30x64xf32> to vector<30x64xf32>
    %cst_10 = arith.constant dense<0.000000e+00> : vector<16x64xf32>
    %21 = tpu.matmul %18, %20, %cst_10 {dimension_numbers = #tpu.dot_dimension_numbers<[1], [0], [0], [1], [0, 0, 1, 1], [], []>} : vector<16x30xf32>, vector<30x64xf32>, vector<16x64xf32> -> vector<16x64xf32>
    %22 = arith.addf %15, %21 : vector<16x64xf32>
    %c0_11 = arith.constant 0 : index
    %c0_12 = arith.constant 0 : index
    %23 = vector.load %arg3[%c0_11, %c0_12] : memref<1x64xf32, #tpu.memory_space<vmem>>, vector<1x64xf32>
    %24 = vector.broadcast %23 : vector<1x64xf32> to vector<16x64xf32>
    %25 = arith.addf %22, %24 : vector<16x64xf32>
    %cst_13 = arith.constant 0.000000e+00 : f32
    %26 = vector.broadcast %cst_13 : f32 to vector<16x64xf32>
    %27 = arith.maximumf %25, %26 : vector<16x64xf32>
    %c0_14 = arith.constant 0 : index
    %c0_15 = arith.constant 0 : index
    %28 = vector.load %arg5[%c0_14, %c0_15] : memref<1x32xf32, #tpu.memory_space<vmem>>, vector<1x32xf32>
    %29 = vector.extract_strided_slice %27 {offsets = [0, 0], sizes = [1, 64], strides = [1, 1]} : vector<16x64xf32> to vector<1x64xf32>
    %c0_16 = arith.constant 0 : index
    %c0_17 = arith.constant 0 : index
    %c0_18 = arith.constant 0 : index
    %30 = vector.load %arg4[%c0_16, %c0_17, %c0_18] : memref<8x64x32xf32, #tpu.memory_space<vmem>>, vector<1x64x32xf32>
    %31 = vector.shape_cast %30 : vector<1x64x32xf32> to vector<64x32xf32>
    %cst_19 = arith.constant dense<0.000000e+00> : vector<1x32xf32>
    %32 = tpu.matmul %29, %31, %cst_19 {dimension_numbers = #tpu.dot_dimension_numbers<[1], [0], [0], [1], [0, 0, 1, 1], [], []>} : vector<1x64xf32>, vector<64x32xf32>, vector<1x32xf32> -> vector<1x32xf32>
    %33 = arith.addf %28, %32 : vector<1x32xf32>
    %34 = vector.extract_strided_slice %27 {offsets = [1, 0], sizes = [1, 64], strides = [1, 1]} : vector<16x64xf32> to vector<1x64xf32>
    %c1_20 = arith.constant 1 : index
    %c0_21 = arith.constant 0 : index
    %c0_22 = arith.constant 0 : index
    %35 = vector.load %arg4[%c1_20, %c0_21, %c0_22] : memref<8x64x32xf32, #tpu.memory_space<vmem>>, vector<1x64x32xf32>
    %36 = vector.shape_cast %35 : vector<1x64x32xf32> to vector<64x32xf32>
    %cst_23 = arith.constant dense<0.000000e+00> : vector<1x32xf32>
    %37 = tpu.matmul %34, %36, %cst_23 {dimension_numbers = #tpu.dot_dimension_numbers<[1], [0], [0], [1], [0, 0, 1, 1], [], []>} : vector<1x64xf32>, vector<64x32xf32>, vector<1x32xf32> -> vector<1x32xf32>
    %38 = arith.addf %33, %37 : vector<1x32xf32>
    %39 = vector.extract_strided_slice %27 {offsets = [2, 0], sizes = [1, 64], strides = [1, 1]} : vector<16x64xf32> to vector<1x64xf32>
    %c2_24 = arith.constant 2 : index
    %c0_25 = arith.constant 0 : index
    %c0_26 = arith.constant 0 : index
    %40 = vector.load %arg4[%c2_24, %c0_25, %c0_26] : memref<8x64x32xf32, #tpu.memory_space<vmem>>, vector<1x64x32xf32>
    %41 = vector.shape_cast %40 : vector<1x64x32xf32> to vector<64x32xf32>
    %cst_27 = arith.constant dense<0.000000e+00> : vector<1x32xf32>
    %42 = tpu.matmul %39, %41, %cst_27 {dimension_numbers = #tpu.dot_dimension_numbers<[1], [0], [0], [1], [0, 0, 1, 1], [], []>} : vector<1x64xf32>, vector<64x32xf32>, vector<1x32xf32> -> vector<1x32xf32>
    %43 = arith.addf %38, %42 : vector<1x32xf32>
    %44 = vector.extract_strided_slice %27 {offsets = [3, 0], sizes = [1, 64], strides = [1, 1]} : vector<16x64xf32> to vector<1x64xf32>
    %c3 = arith.constant 3 : index
    %c0_28 = arith.constant 0 : index
    %c0_29 = arith.constant 0 : index
    %45 = vector.load %arg4[%c3, %c0_28, %c0_29] : memref<8x64x32xf32, #tpu.memory_space<vmem>>, vector<1x64x32xf32>
    %46 = vector.shape_cast %45 : vector<1x64x32xf32> to vector<64x32xf32>
    %cst_30 = arith.constant dense<0.000000e+00> : vector<1x32xf32>
    %47 = tpu.matmul %44, %46, %cst_30 {dimension_numbers = #tpu.dot_dimension_numbers<[1], [0], [0], [1], [0, 0, 1, 1], [], []>} : vector<1x64xf32>, vector<64x32xf32>, vector<1x32xf32> -> vector<1x32xf32>
    %48 = arith.addf %43, %47 : vector<1x32xf32>
    %49 = vector.extract_strided_slice %27 {offsets = [4, 0], sizes = [1, 64], strides = [1, 1]} : vector<16x64xf32> to vector<1x64xf32>
    %c4 = arith.constant 4 : index
    %c0_31 = arith.constant 0 : index
    %c0_32 = arith.constant 0 : index
    %50 = vector.load %arg4[%c4, %c0_31, %c0_32] : memref<8x64x32xf32, #tpu.memory_space<vmem>>, vector<1x64x32xf32>
    %51 = vector.shape_cast %50 : vector<1x64x32xf32> to vector<64x32xf32>
    %cst_33 = arith.constant dense<0.000000e+00> : vector<1x32xf32>
    %52 = tpu.matmul %49, %51, %cst_33 {dimension_numbers = #tpu.dot_dimension_numbers<[1], [0], [0], [1], [0, 0, 1, 1], [], []>} : vector<1x64xf32>, vector<64x32xf32>, vector<1x32xf32> -> vector<1x32xf32>
    %53 = arith.addf %48, %52 : vector<1x32xf32>
    %54 = vector.extract_strided_slice %27 {offsets = [5, 0], sizes = [1, 64], strides = [1, 1]} : vector<16x64xf32> to vector<1x64xf32>
    %c5 = arith.constant 5 : index
    %c0_34 = arith.constant 0 : index
    %c0_35 = arith.constant 0 : index
    %55 = vector.load %arg4[%c5, %c0_34, %c0_35] : memref<8x64x32xf32, #tpu.memory_space<vmem>>, vector<1x64x32xf32>
    %56 = vector.shape_cast %55 : vector<1x64x32xf32> to vector<64x32xf32>
    %cst_36 = arith.constant dense<0.000000e+00> : vector<1x32xf32>
    %57 = tpu.matmul %54, %56, %cst_36 {dimension_numbers = #tpu.dot_dimension_numbers<[1], [0], [0], [1], [0, 0, 1, 1], [], []>} : vector<1x64xf32>, vector<64x32xf32>, vector<1x32xf32> -> vector<1x32xf32>
    %58 = arith.addf %53, %57 : vector<1x32xf32>
    %59 = vector.extract_strided_slice %27 {offsets = [6, 0], sizes = [1, 64], strides = [1, 1]} : vector<16x64xf32> to vector<1x64xf32>
    %c6 = arith.constant 6 : index
    %c0_37 = arith.constant 0 : index
    %c0_38 = arith.constant 0 : index
    %60 = vector.load %arg4[%c6, %c0_37, %c0_38] : memref<8x64x32xf32, #tpu.memory_space<vmem>>, vector<1x64x32xf32>
    %61 = vector.shape_cast %60 : vector<1x64x32xf32> to vector<64x32xf32>
    %cst_39 = arith.constant dense<0.000000e+00> : vector<1x32xf32>
    %62 = tpu.matmul %59, %61, %cst_39 {dimension_numbers = #tpu.dot_dimension_numbers<[1], [0], [0], [1], [0, 0, 1, 1], [], []>} : vector<1x64xf32>, vector<64x32xf32>, vector<1x32xf32> -> vector<1x32xf32>
    %63 = arith.addf %58, %62 : vector<1x32xf32>
    %64 = vector.extract_strided_slice %27 {offsets = [7, 0], sizes = [1, 64], strides = [1, 1]} : vector<16x64xf32> to vector<1x64xf32>
    %c7 = arith.constant 7 : index
    %c0_40 = arith.constant 0 : index
    %c0_41 = arith.constant 0 : index
    %65 = vector.load %arg4[%c7, %c0_40, %c0_41] : memref<8x64x32xf32, #tpu.memory_space<vmem>>, vector<1x64x32xf32>
    %66 = vector.shape_cast %65 : vector<1x64x32xf32> to vector<64x32xf32>
    %cst_42 = arith.constant dense<0.000000e+00> : vector<1x32xf32>
    %67 = tpu.matmul %64, %66, %cst_42 {dimension_numbers = #tpu.dot_dimension_numbers<[1], [0], [0], [1], [0, 0, 1, 1], [], []>} : vector<1x64xf32>, vector<64x32xf32>, vector<1x32xf32> -> vector<1x32xf32>
    %68 = arith.addf %63, %67 : vector<1x32xf32>
    %cst_43 = arith.constant 0.000000e+00 : f32
    %69 = vector.broadcast %cst_43 : f32 to vector<1x32xf32>
    %70 = arith.maximumf %68, %69 : vector<1x32xf32>
    %c0_44 = arith.constant 0 : index
    %c0_45 = arith.constant 0 : index
    %71 = vector.load %arg5[%c0_44, %c0_45] : memref<1x32xf32, #tpu.memory_space<vmem>>, vector<1x32xf32>
    %72 = vector.extract_strided_slice %27 {offsets = [8, 0], sizes = [1, 64], strides = [1, 1]} : vector<16x64xf32> to vector<1x64xf32>
    %c0_46 = arith.constant 0 : index
    %c0_47 = arith.constant 0 : index
    %c0_48 = arith.constant 0 : index
    %73 = vector.load %arg4[%c0_46, %c0_47, %c0_48] : memref<8x64x32xf32, #tpu.memory_space<vmem>>, vector<1x64x32xf32>
    %74 = vector.shape_cast %73 : vector<1x64x32xf32> to vector<64x32xf32>
    %cst_49 = arith.constant dense<0.000000e+00> : vector<1x32xf32>
    %75 = tpu.matmul %72, %74, %cst_49 {dimension_numbers = #tpu.dot_dimension_numbers<[1], [0], [0], [1], [0, 0, 1, 1], [], []>} : vector<1x64xf32>, vector<64x32xf32>, vector<1x32xf32> -> vector<1x32xf32>
    %76 = arith.addf %71, %75 : vector<1x32xf32>
    %77 = vector.extract_strided_slice %27 {offsets = [9, 0], sizes = [1, 64], strides = [1, 1]} : vector<16x64xf32> to vector<1x64xf32>
    %c1_50 = arith.constant 1 : index
    %c0_51 = arith.constant 0 : index
    %c0_52 = arith.constant 0 : index
    %78 = vector.load %arg4[%c1_50, %c0_51, %c0_52] : memref<8x64x32xf32, #tpu.memory_space<vmem>>, vector<1x64x32xf32>
    %79 = vector.shape_cast %78 : vector<1x64x32xf32> to vector<64x32xf32>
    %cst_53 = arith.constant dense<0.000000e+00> : vector<1x32xf32>
    %80 = tpu.matmul %77, %79, %cst_53 {dimension_numbers = #tpu.dot_dimension_numbers<[1], [0], [0], [1], [0, 0, 1, 1], [], []>} : vector<1x64xf32>, vector<64x32xf32>, vector<1x32xf32> -> vector<1x32xf32>
    %81 = arith.addf %76, %80 : vector<1x32xf32>
    %82 = vector.extract_strided_slice %27 {offsets = [10, 0], sizes = [1, 64], strides = [1, 1]} : vector<16x64xf32> to vector<1x64xf32>
    %c2_54 = arith.constant 2 : index
    %c0_55 = arith.constant 0 : index
    %c0_56 = arith.constant 0 : index
    %83 = vector.load %arg4[%c2_54, %c0_55, %c0_56] : memref<8x64x32xf32, #tpu.memory_space<vmem>>, vector<1x64x32xf32>
    %84 = vector.shape_cast %83 : vector<1x64x32xf32> to vector<64x32xf32>
    %cst_57 = arith.constant dense<0.000000e+00> : vector<1x32xf32>
    %85 = tpu.matmul %82, %84, %cst_57 {dimension_numbers = #tpu.dot_dimension_numbers<[1], [0], [0], [1], [0, 0, 1, 1], [], []>} : vector<1x64xf32>, vector<64x32xf32>, vector<1x32xf32> -> vector<1x32xf32>
    %86 = arith.addf %81, %85 : vector<1x32xf32>
    %87 = vector.extract_strided_slice %27 {offsets = [11, 0], sizes = [1, 64], strides = [1, 1]} : vector<16x64xf32> to vector<1x64xf32>
    %c3_58 = arith.constant 3 : index
    %c0_59 = arith.constant 0 : index
    %c0_60 = arith.constant 0 : index
    %88 = vector.load %arg4[%c3_58, %c0_59, %c0_60] : memref<8x64x32xf32, #tpu.memory_space<vmem>>, vector<1x64x32xf32>
    %89 = vector.shape_cast %88 : vector<1x64x32xf32> to vector<64x32xf32>
    %cst_61 = arith.constant dense<0.000000e+00> : vector<1x32xf32>
    %90 = tpu.matmul %87, %89, %cst_61 {dimension_numbers = #tpu.dot_dimension_numbers<[1], [0], [0], [1], [0, 0, 1, 1], [], []>} : vector<1x64xf32>, vector<64x32xf32>, vector<1x32xf32> -> vector<1x32xf32>
    %91 = arith.addf %86, %90 : vector<1x32xf32>
    %92 = vector.extract_strided_slice %27 {offsets = [12, 0], sizes = [1, 64], strides = [1, 1]} : vector<16x64xf32> to vector<1x64xf32>
    %c4_62 = arith.constant 4 : index
    %c0_63 = arith.constant 0 : index
    %c0_64 = arith.constant 0 : index
    %93 = vector.load %arg4[%c4_62, %c0_63, %c0_64] : memref<8x64x32xf32, #tpu.memory_space<vmem>>, vector<1x64x32xf32>
    %94 = vector.shape_cast %93 : vector<1x64x32xf32> to vector<64x32xf32>
    %cst_65 = arith.constant dense<0.000000e+00> : vector<1x32xf32>
    %95 = tpu.matmul %92, %94, %cst_65 {dimension_numbers = #tpu.dot_dimension_numbers<[1], [0], [0], [1], [0, 0, 1, 1], [], []>} : vector<1x64xf32>, vector<64x32xf32>, vector<1x32xf32> -> vector<1x32xf32>
    %96 = arith.addf %91, %95 : vector<1x32xf32>
    %97 = vector.extract_strided_slice %27 {offsets = [13, 0], sizes = [1, 64], strides = [1, 1]} : vector<16x64xf32> to vector<1x64xf32>
    %c5_66 = arith.constant 5 : index
    %c0_67 = arith.constant 0 : index
    %c0_68 = arith.constant 0 : index
    %98 = vector.load %arg4[%c5_66, %c0_67, %c0_68] : memref<8x64x32xf32, #tpu.memory_space<vmem>>, vector<1x64x32xf32>
    %99 = vector.shape_cast %98 : vector<1x64x32xf32> to vector<64x32xf32>
    %cst_69 = arith.constant dense<0.000000e+00> : vector<1x32xf32>
    %100 = tpu.matmul %97, %99, %cst_69 {dimension_numbers = #tpu.dot_dimension_numbers<[1], [0], [0], [1], [0, 0, 1, 1], [], []>} : vector<1x64xf32>, vector<64x32xf32>, vector<1x32xf32> -> vector<1x32xf32>
    %101 = arith.addf %96, %100 : vector<1x32xf32>
    %102 = vector.extract_strided_slice %27 {offsets = [14, 0], sizes = [1, 64], strides = [1, 1]} : vector<16x64xf32> to vector<1x64xf32>
    %c6_70 = arith.constant 6 : index
    %c0_71 = arith.constant 0 : index
    %c0_72 = arith.constant 0 : index
    %103 = vector.load %arg4[%c6_70, %c0_71, %c0_72] : memref<8x64x32xf32, #tpu.memory_space<vmem>>, vector<1x64x32xf32>
    %104 = vector.shape_cast %103 : vector<1x64x32xf32> to vector<64x32xf32>
    %cst_73 = arith.constant dense<0.000000e+00> : vector<1x32xf32>
    %105 = tpu.matmul %102, %104, %cst_73 {dimension_numbers = #tpu.dot_dimension_numbers<[1], [0], [0], [1], [0, 0, 1, 1], [], []>} : vector<1x64xf32>, vector<64x32xf32>, vector<1x32xf32> -> vector<1x32xf32>
    %106 = arith.addf %101, %105 : vector<1x32xf32>
    %107 = vector.extract_strided_slice %27 {offsets = [15, 0], sizes = [1, 64], strides = [1, 1]} : vector<16x64xf32> to vector<1x64xf32>
    %c7_74 = arith.constant 7 : index
    %c0_75 = arith.constant 0 : index
    %c0_76 = arith.constant 0 : index
    %108 = vector.load %arg4[%c7_74, %c0_75, %c0_76] : memref<8x64x32xf32, #tpu.memory_space<vmem>>, vector<1x64x32xf32>
    %109 = vector.shape_cast %108 : vector<1x64x32xf32> to vector<64x32xf32>
    %cst_77 = arith.constant dense<0.000000e+00> : vector<1x32xf32>
    %110 = tpu.matmul %107, %109, %cst_77 {dimension_numbers = #tpu.dot_dimension_numbers<[1], [0], [0], [1], [0, 0, 1, 1], [], []>} : vector<1x64xf32>, vector<64x32xf32>, vector<1x32xf32> -> vector<1x32xf32>
    %111 = arith.addf %106, %110 : vector<1x32xf32>
    %cst_78 = arith.constant 0.000000e+00 : f32
    %112 = vector.broadcast %cst_78 : f32 to vector<1x32xf32>
    %113 = arith.maximumf %111, %112 : vector<1x32xf32>
    %114 = tpu.concatenate %70, %113 in 0 : vector<1x32xf32>, vector<1x32xf32> -> vector<2x32xf32>
    %c0_79 = arith.constant 0 : index
    %c0_80 = arith.constant 0 : index
    %115 = vector.load %arg1[%c0_79, %c0_80] : memref<2x8xf32, #tpu.memory_space<vmem>>, vector<2x8xf32>
    %c0_81 = arith.constant 0 : index
    %c0_82 = arith.constant 0 : index
    %116 = vector.load %arg6[%c0_81, %c0_82] : memref<8x32xf32, #tpu.memory_space<vmem>>, vector<8x32xf32>
    %cst_83 = arith.constant dense<0.000000e+00> : vector<2x32xf32>
    %117 = tpu.matmul %115, %116, %cst_83 {dimension_numbers = #tpu.dot_dimension_numbers<[1], [0], [0], [1], [0, 0, 1, 1], [], []>} : vector<2x8xf32>, vector<8x32xf32>, vector<2x32xf32> -> vector<2x32xf32>
    %c0_84 = arith.constant 0 : index
    %c0_85 = arith.constant 0 : index
    %118 = vector.load %arg7[%c0_84, %c0_85] : memref<1x32xf32, #tpu.memory_space<vmem>>, vector<1x32xf32>
    %119 = vector.broadcast %118 : vector<1x32xf32> to vector<2x32xf32>
    %120 = arith.addf %117, %119 : vector<2x32xf32>
    %cst_86 = arith.constant 0.000000e+00 : f32
    %121 = vector.broadcast %cst_86 : f32 to vector<2x32xf32>
    %122 = arith.maximumf %120, %121 : vector<2x32xf32>
    %c0_87 = arith.constant 0 : index
    %c0_88 = arith.constant 0 : index
    %123 = vector.load %arg8[%c0_87, %c0_88] : memref<32x32xf32, #tpu.memory_space<vmem>>, vector<32x32xf32>
    %cst_89 = arith.constant dense<0.000000e+00> : vector<2x32xf32>
    %124 = tpu.matmul %114, %123, %cst_89 {dimension_numbers = #tpu.dot_dimension_numbers<[1], [0], [0], [1], [0, 0, 1, 1], [], []>} : vector<2x32xf32>, vector<32x32xf32>, vector<2x32xf32> -> vector<2x32xf32>
    %c0_90 = arith.constant 0 : index
    %c0_91 = arith.constant 0 : index
    %125 = vector.load %arg9[%c0_90, %c0_91] : memref<32x32xf32, #tpu.memory_space<vmem>>, vector<32x32xf32>
    %cst_92 = arith.constant dense<0.000000e+00> : vector<2x32xf32>
    %126 = tpu.matmul %122, %125, %cst_92 {dimension_numbers = #tpu.dot_dimension_numbers<[1], [0], [0], [1], [0, 0, 1, 1], [], []>} : vector<2x32xf32>, vector<32x32xf32>, vector<2x32xf32> -> vector<2x32xf32>
    %127 = arith.addf %124, %126 : vector<2x32xf32>
    %c0_93 = arith.constant 0 : index
    %c0_94 = arith.constant 0 : index
    %128 = vector.load %arg10[%c0_93, %c0_94] : memref<1x32xf32, #tpu.memory_space<vmem>>, vector<1x32xf32>
    %129 = vector.broadcast %128 : vector<1x32xf32> to vector<2x32xf32>
    %130 = arith.addf %127, %129 : vector<2x32xf32>
    %cst_95 = arith.constant 0.000000e+00 : f32
    %131 = vector.broadcast %cst_95 : f32 to vector<2x32xf32>
    %132 = arith.maximumf %130, %131 : vector<2x32xf32>
    %c0_96 = arith.constant 0 : index
    %c0_97 = arith.constant 0 : index
    %133 = vector.load %arg11[%c0_96, %c0_97] : memref<32x6xf32, #tpu.memory_space<vmem>>, vector<32x6xf32>
    %cst_98 = arith.constant dense<0.000000e+00> : vector<2x6xf32>
    %134 = tpu.matmul %132, %133, %cst_98 {dimension_numbers = #tpu.dot_dimension_numbers<[1], [0], [0], [1], [0, 0, 1, 1], [], []>} : vector<2x32xf32>, vector<32x6xf32>, vector<2x6xf32> -> vector<2x6xf32>
    %c0_99 = arith.constant 0 : index
    %c0_100 = arith.constant 0 : index
    %135 = vector.load %arg12[%c0_99, %c0_100] : memref<1x6xf32, #tpu.memory_space<vmem>>, vector<1x6xf32>
    %136 = vector.broadcast %135 : vector<1x6xf32> to vector<2x6xf32>
    %137 = arith.addf %134, %136 : vector<2x6xf32>
    %cst_101 = arith.constant dense<0xFF800000> : vector<2xf32>
    %138 = vector.multi_reduction <maximumf>, %137, %cst_101 [1] : vector<2x6xf32> to vector<2xf32>
    %139 = vector.shape_cast %138 : vector<2xf32> to vector<2x1xf32>
    %140 = vector.broadcast %139 : vector<2x1xf32> to vector<2x6xf32>
    %141 = arith.subf %137, %140 : vector<2x6xf32>
    %142 = math.exp %141 : vector<2x6xf32>
    %cst_102 = arith.constant dense<0.000000e+00> : vector<2xf32>
    %143 = vector.multi_reduction <add>, %142, %cst_102 [1] : vector<2x6xf32> to vector<2xf32>
    %144 = vector.shape_cast %143 : vector<2xf32> to vector<2x1xf32>
    %145 = vector.broadcast %144 : vector<2x1xf32> to vector<2x6xf32>
    %146 = arith.divf %142, %145 : vector<2x6xf32>
    %c0_103 = arith.constant 0 : index
    %c0_104 = arith.constant 0 : index
    %147 = vector.load %arg13[%c0_103, %c0_104] : memref<2x6xf32, #tpu.memory_space<vmem>>, vector<2x6xf32>
    tpu.vector_store %arg13[%c0_103, %c0_104], %146 {strides = array<i32>} : memref<2x6xf32, #tpu.memory_space<vmem>>, vector<2x6xf32>,
    return
  }
}

</mosaic_0001>

<bundles_post_ra>
// kernel: forward.1
= control target key start
LH: loop header
LB: loop body
LE: loop exit
PB: predicated region body
PF: predicated region fallthrough
CT: control target
= control target key end

     0   :  { %vm50_vm0 = vcmask 1045504   ;;  %vm2927_vm1 = vmmov 1   ;;  %vm59_vm3 = vcmask 1046528   ;;  %vm72_vm4 = vcmask 244736   ;;  %s3497_s0 = inlined_call_operand.vmem [shape: f32[20,30], index: 0, kind: input, shape index: {}]   ;;  %s3498_s1 = inlined_call_operand.vmem [shape: f32[2,8], index: 1, kind: input, shape index: {}]   ;;  %s3499_s2 = inlined_call_operand.vmem [shape: f32[3,30,64], index: 2, kind: input, shape index: {}]   ;;  %s3500_s3 = inlined_call_operand.vmem [shape: f32[1,64], index: 3, kind: input, shape index: {}]   ;;  %s3501_s4 = inlined_call_operand.vmem [shape: f32[8,64,32], index: 4, kind: input, shape index: {}]   ;;  %s3502_s5 = inlined_call_operand.vmem [shape: f32[1,32], index: 5, kind: input, shape index: {}]   ;;  %s3503_s6 = inlined_call_operand.vmem [shape: f32[8,32], index: 6, kind: input, shape index: {}]   ;;  %s3504_s7 = inlined_call_operand.vmem [shape: f32[1,32], index: 7, kind: input, shape index: {}]   ;;  %s3505_s8 = inlined_call_operand.vmem [shape: f32[32,32], index: 8, kind: input, shape index: {}]   ;;  %s3506_s9 = inlined_call_operand.vmem [shape: f32[32,32], index: 9, kind: input, shape index: {}]   ;;  %s3507_s10 = inlined_call_operand.vmem [shape: f32[1,32], index: 10, kind: input, shape index: {}]   ;;  %s3508_s11 = inlined_call_operand.vmem [shape: f32[32,6], index: 11, kind: input, shape index: {}]   ;;  %s3509_s12 = inlined_call_operand.vmem [shape: f32[1,6], index: 12, kind: input, shape index: {}]   ;;  %s3510_s13 = inlined_call_operand.hbm [shape: f32[2,6], index: 13, kind: output, shape index: {}]  }
   0x1   :  { %v1969_v0 = vld [vmem:[%s3499_s2 + $0x20] sm:$0xff]  ;;  %v1970_v1 = vld [vmem:[%s3499_s2 + $0x28] sm:$0xff]  ;;  %v1971_v2 = vld [vmem:[%s3499_s2 + $0x30] sm:$0xff]  ;;  %vm63_vm5 = vcmask 1044480  }
   0x2   :  { %v2620_v3 = vpack.c.bf16 %v1970_v1, %v1969_v0  ;;  %v1972_v4 = vld [vmem:[%s3499_s2 + $0x38] sm:$0x3f]  ;;  %vm3015_vm2 = vmpackc.low %vm50_vm0, %vm2927_vm1  ;;  %v45_v6 = vld [vmem:[%s3497_s0] sm:$0xff] }
   0x3   :  { %v2624_v7 = vpack.c.bf16 %v1972_v4, %v1971_v2  ;;  %v3025_v8 = vld [vmem:[%s3497_s0 + $0x8] sm:$0xff]  ;;  %v60_v9 = vrot.slane %v45_v6, 1  ;;  %v3030_v10 = vld [vmem:[%s3497_s0 + $0x10] sm:$0xf]  ;;  %v54_v11 = vld [vmem:[%s3499_s2] sm:$0xff] }
   0x4   :  { %2621 = vmatprep.subr.bf16.mxu0 %v2620_v3  ;;  %v61_v12 = vrot.slane %v3025_v8, 1  ;;  %v55_v13 = vld [vmem:[%s3499_s2 + $0x8] sm:$0xff]  ;;  %v64_v14 = vrot.slane %v3025_v8, 3  ;;  %v65_v15 = vrot.slane %v3030_v10, 3  ;;  %v56_v18 = vld [vmem:[%s3499_s2 + $0x10] sm:$0xff]  ;;  %v344_v20 = vld [vmem:[%s3501_s4] sm:$0xff] }
   0x5   :  { %2623 = vmatpush3.bf16.msra.mxu0 %v2620_v3  ;;  %v2630_v17 = vpack.c.bf16 %v55_v13, %v54_v11  ;;  %v57_v19 = vld [vmem:[%s3499_s2 + $0x18] sm:$0x3f]  ;;  %v345_v21 = vld [vmem:[%s3501_s4 + $0x8] sm:$0xff]  ;;  %v346_v22 = vld [vmem:[%s3501_s4 + $0x10] sm:$0xff] }
   0x6   :  { %2626 = vmatprep.subr.msk.bf16.mxu0 %vm3015_vm2, %v2624_v7  ;;  %v62_v16 = vsel %vm59_vm3, %v60_v9, %v61_v12  ;;  %v347_v23 = vld [vmem:[%s3501_s4 + $0x18] sm:$0xff]  ;;  %v2651_v24 = vpack.c.bf16 %v345_v21, %v344_v20 }
   0x7   :  { %2253 = vmatprep.mubr.msk.f32.mxu0 %vm72_vm4, %v62_v16 }
   0x8   :  { %18 = vsyncpa [#allocation3], 0  ;;  %v66_v25 = vsel %vm63_vm5, %v64_v14, %v65_v15  ;;  %v2928_v26 = vmov 0.0|0.0   ;;  %v2634_v27 = vpack.c.bf16 %v57_v19, %v56_v18  ;;  %v1979_v28 = vld [vmem:[%s3499_s2 + $0x40] sm:$0xff]  ;;  %v2654_v29 = vpack.c.bf16 %v347_v23, %v346_v22  ;;  %v1980_v30 = vld [vmem:[%s3499_s2 + $0x48] sm:$0xff] }
   0x9   :  { %2629 = vmatpush3.bf16.msk.msra.mxu0 %vm3015_vm2, %v2624_v7  ;;  %2650 = vmatprep.subr.bf16.mxu1 %v2928_v26  ;;  %v348_v31 = vld [vmem:[%s3501_s4 + $0x20] sm:$0xff]  ;;  %v349_v32 = vld [vmem:[%s3501_s4 + $0x28] sm:$0xff]  ;;  %v51_v33 = vrot.slane %v3025_v8, 2  ;;  %v52_v34 = vrot.slane %v3030_v10, 2  ;;  %v2640_v35 = vpack.c.bf16 %v1980_v30, %v1979_v28  ;;  %v237_v36 = vrot.slane %v45_v6, 2  ;;  %v1981_v38 = vld [vmem:[%s3499_s2 + $0x50] sm:$0xff] }
   0xa   :  { %2631 = vmatprep.subr.bf16.mxu0 %v2630_v17  ;;  %2652 = vmatpush3.bf16.msra.mxu1 %v2651_v24  ;;  %v2657_v37 = vpack.c.bf16 %v349_v32, %v348_v31  ;;  %v1982_v39 = vld [vmem:[%s3499_s2 + $0x58] sm:$0x3f]  ;;  %v240_v43 = vrot.slane %v3025_v8, 4  ;;  %v241_v44 = vrot.slane %v3030_v10, 4  ;;  %vm239_vm6 = vcmask 1043456   ;;  %v350_v46 = vld [vmem:[%s3501_s4 + $0x30] sm:$0xff] }
   0xb   :  { %2653 = vmatprep.subr.bf16.mxu1 %v2928_v26  ;;  %v53_v40 = vsel %vm50_vm0, %v51_v33, %v52_v34  ;;  %v2644_v41 = vpack.c.bf16 %v1982_v39, %v1981_v38  ;;  %v238_v42 = vsel %vm50_vm0, %v237_v36, %v51_v33  ;;  %v351_v47 = vld [vmem:[%s3501_s4 + $0x38] sm:$0xff]  ;;  %vm2929_vm7 = vmmov 0   ;;  %v1986_v50 = vld [vmem:[%s3500_s3] ss:$0 sm:$0xff]  ;;  %v1989_v52 = vld [vmem:[%s3501_s4 + $0x48] sm:$0xff] }
   0xc   :  { %2254 = vmatmul.mubr.msk.f32.vlgmr.msra.gmra.mrb[0].mxu0 %vm72_vm4, %v66_v25  ;;  %v242_v45 = vsel %vm239_vm6, %v240_v43, %v241_v44  ;;  %v2660_v48 = vpack.c.bf16 %v351_v47, %v350_v46  ;;  %v2930_v49 = vmov 0.0   ;;  %v1988_v51 = vld [vmem:[%s3501_s4 + $0x40] sm:$0xff]  ;;  %vm352_vm8 = vcmask 523264   ;;  %v1990_v59 = vld [vmem:[%s3501_s4 + $0x50] sm:$0xff]  ;;  %v1991_v60 = vld [vmem:[%s3501_s4 + $0x58] sm:$0xff] }
   0xd   :  { %2633 = vmatpush3.bf16.msra.mxu0 %v2630_v17  ;;  %2264 = vmatprep.mubr.msk.f32.mxu0 %vm72_vm4, %v45_v6  ;;  %v2663_v57 = vpack.c.bf16 %v1989_v52, %v1988_v51  ;;  %v2666_v62 = vpack.c.bf16 %v1991_v60, %v1990_v59  ;;  %v1992_v63 = vld [vmem:[%s3501_s4 + $0x60] sm:$0xff]  ;;  %v1993_v0 = vld [vmem:[%s3501_s4 + $0x68] sm:$0xff]  ;;  %v1994_v2 = vld [vmem:[%s3501_s4 + $0x70] sm:$0xff]  ;;  %vm1619_vm9 = vcmask 64512   ;;  %vm1608_vm10 = vcmask 1040384  }
   0xe   :  { %2636 = vmatprep.subr.msk.bf16.mxu0 %vm3015_vm2, %v2634_v27  ;;  %2655 = vmatpush3.bf16.msra.mxu1 %v2654_v29  ;;  %v2669_v1 = vpack.c.bf16 %v1993_v0, %v1992_v63  ;;  %v1995_v3 = vld [vmem:[%s3501_s4 + $0x78] sm:$0xff]  ;;  %v1997_v5 = vld [vmem:[%s3501_s4 + $0x80] sm:$0xff]  ;;  %v1998_v6 = vld [vmem:[%s3501_s4 + $0x88] sm:$0xff]  ;;  %vm1702_vm11 = vcmask 261120   ;;  %vm1942_vm12 = vcmask 41984  }
   0xf   :  { %2656 = vmatprep.subr.bf16.mxu1 %v2928_v26  ;;  %2294 = vmatprep.mubr.msk.f32.mxu1 %vm2929_vm7, %v2930_v49  ;;  %v2672_v4 = vpack.c.bf16 %v1995_v3, %v1994_v2  ;;  %v2675_v7 = vpack.c.bf16 %v1998_v6, %v1997_v5  ;;  %v1999_v9 = vld [vmem:[%s3501_s4 + $0x90] sm:$0xff]  ;;  %v2000_v10 = vld [vmem:[%s3501_s4 + $0x98] sm:$0xff]  ;;  %v2001_v13 = vld [vmem:[%s3501_s4 + $0xa0] sm:$0xff] }
  0x10   :  { %v2678_v12 = vpack.c.bf16 %v2000_v10, %v1999_v9  ;;  %v2002_v14 = vld [vmem:[%s3501_s4 + $0xa8] sm:$0xff]  ;;  %v2003_v16 = vld [vmem:[%s3501_s4 + $0xb0] sm:$0xff]  ;;  %v2004_v17 = vld [vmem:[%s3501_s4 + $0xb8] sm:$0xff] }
  0x11   :  { %2639 = vmatpush3.bf16.msk.msra.mxu0 %vm3015_vm2, %v2634_v27  ;;  %v2681_v15 = vpack.c.bf16 %v2002_v14, %v2001_v13  ;;  %v2684_v18 = vpack.c.bf16 %v2004_v17, %v2003_v16  ;;  %v2006_v19 = vld [vmem:[%s3501_s4 + $0xc0] sm:$0xff]  ;;  %v2007_v20 = vld [vmem:[%s3501_s4 + $0xc8] sm:$0xff]  ;;  %v2008_v23 = vld [vmem:[%s3501_s4 + $0xd0] sm:$0xff] }
  0x12   :  { %2641 = vmatprep.subr.bf16.mxu0 %v2640_v35  ;;  %2658 = vmatpush3.bf16.msra.mxu1 %v2657_v37  ;;  %v2687_v21 = vpack.c.bf16 %v2007_v20, %v2006_v19  ;;  %v2010_v28 = vld [vmem:[%s3501_s4 + $0xe0] sm:$0xff]  ;;  %v2012_v31 = vld [vmem:[%s3501_s4 + $0xf0] sm:$0xff]  ;;  %v2013_v32 = vld [vmem:[%s3501_s4 + $0xf8] sm:$0xff] }
  0x13   :  { %2659 = vmatprep.subr.bf16.mxu1 %v2928_v26  ;;  %v2696_v33 = vpack.c.bf16 %v2013_v32, %v2012_v31  ;;  %v2015_v34 = vld [vmem:[%s3501_s4 + $0x100] sm:$0xff]  ;;  %v2017_v38 = vld [vmem:[%s3501_s4 + $0x110] sm:$0xff]  ;;  %v2018_v39 = vld [vmem:[%s3501_s4 + $0x118] sm:$0xff] }
  0x14   :  { %2265 = vmatmul.mubr.msk.f32.vlgmr.msra.gmra.mrb[0].mxu0 %vm72_vm4, %v53_v40  ;;  %v2020_v43 = vld [vmem:[%s3501_s4 + $0x128] sm:$0xff]  ;;  %v2022_v46 = vld [vmem:[%s3501_s4 + $0x138] sm:$0xff]  ;;  %v2035_v5 = vld [vmem:[%s3501_s4 + $0x190] sm:$0xff] }
  0x15   :  { %2643 = vmatpush3.bf16.msra.mxu0 %v2640_v35  ;;  %2275 = vmatprep.mubr.msk.f32.mxu0 %vm72_vm4, %v238_v42  ;;  %v2016_v35 = vld [vmem:[%s3501_s4 + $0x108] sm:$0xff]  ;;  %v2019_v42 = vld [vmem:[%s3501_s4 + $0x120] sm:$0xff]  ;;  %v2031_v63 = vld [vmem:[%s3501_s4 + $0x178] sm:$0xff] }
  0x16   :  { %2646 = vmatprep.subr.msk.bf16.mxu0 %vm3015_vm2, %v2644_v41  ;;  %2661 = vmatpush3.bf16.msra.mxu1 %v2660_v48  ;;  %v2699_v36 = vpack.c.bf16 %v2016_v35, %v2015_v34  ;;  %v2705_v44 = vpack.c.bf16 %v2020_v43, %v2019_v42  ;;  %v2029_v59 = vld [vmem:[%s3501_s4 + $0x168] sm:$0xff]  ;;  %v2036_v6 = vld [vmem:[%s3501_s4 + $0x198] sm:$0xff]  ;;  %v2037_v9 = vld [vmem:[%s3501_s4 + $0x1a0] sm:$0xff] }
  0x17   :  { %2662 = vmatprep.subr.bf16.mxu1 %v2928_v26  ;;  %v2034_v2 = vld [vmem:[%s3501_s4 + $0x188] sm:$0xff]  ;;  %v2040_v13 = vld [vmem:[%s3501_s4 + $0x1b8] sm:$0xff]  ;;  %v2044_v19 = vld [vmem:[%s3501_s4 + $0x1d0] sm:$0xff] }
  0x18   :  { %v2038_v10 = vld [vmem:[%s3501_s4 + $0x1a8] sm:$0xff]  ;;  %v2045_v20 = vld [vmem:[%s3501_s4 + $0x1d8] sm:$0xff]  ;;  %v1611_v32 = vld [vmem:[%s3503_s6] sm:$0xff] }
  0x19   :  { %2649 = vmatpush3.bf16.msk.msra.mxu0 %vm3015_vm2, %v2644_v41  ;;  %v2702_v41 = vpack.c.bf16 %v2018_v39, %v2017_v38  ;;  %v2043_v16 = vld [vmem:[%s3501_s4 + $0x1c8] sm:$0xff]  ;;  %v1700_v35 = vld [vmem:[%s3506_s9 + $0x10] sm:$0xff]  ;;  %v1603_v38 = vlaneseq }
  0x1a   :  { %2746 = vmatprep.subr.bf16.mxu0 %v2928_v26 }
  0x1b   :  { %v1604_v39 = vshrl.u32 %v1603_v38, 7 }
  0x1c   :  { %2276 = vmatmul.mubr.msk.f32.vlgmr.msra.gmra.mrb[0].mxu0 %vm72_vm4, %v242_v45  ;;  %v2021_v45 = vld [vmem:[%s3501_s4 + $0x130] sm:$0xff] }
  0x1d   :  { %2748 = vmatpush3.bf16.msra.mxu0 %v2651_v24  ;;  %2446 = vmatprep.mubr.msk.f32.mxu0 %vm2929_vm7, %v2930_v49  ;;  %v2009_v24 = vld [vmem:[%s3501_s4 + $0xd8] sm:$0xff]  ;;  %v2708_v47 = vpack.c.bf16 %v2022_v46, %v2021_v45  ;;  %v1605_v43 = vsub.s32 0, %v1604_v39 }
  0x1e   :  { %2749 = vmatprep.subr.bf16.mxu0 %v2928_v26  ;;  %v2690_v27 = vpack.c.bf16 %v2009_v24, %v2008_v23  ;;  %v2046_v23 = vld [vmem:[%s3501_s4 + $0x1e0] sm:$0xff]  ;;  %v2047_v24 = vld [vmem:[%s3501_s4 + $0x1e8] sm:$0xff] }
  0x21   :  { %2751 = vmatpush3.bf16.msra.mxu0 %v2654_v29  ;;  %v2011_v29 = vld [vmem:[%s3501_s4 + $0xe8] sm:$0xff] }
  0x22   :  { %2752 = vmatprep.subr.bf16.mxu0 %v2928_v26  ;;  %v2693_v30 = vpack.c.bf16 %v2011_v29, %v2010_v28  ;;  %v2049_v28 = vld [vmem:[%s3501_s4 + $0x1f8] sm:$0xff] }
  0x25   :  { %2754 = vmatpush3.bf16.msra.mxu0 %v2657_v37 }
  0x26   :  { %2755 = vmatprep.subr.bf16.mxu0 %v2928_v26 }
  0x29   :  { %2757 = vmatpush3.bf16.msra.mxu0 %v2660_v48  ;;  %v2024_v48 = vld [vmem:[%s3501_s4 + $0x140] sm:$0xff] }
  0x2a   :  { %2758 = vmatprep.subr.bf16.mxu0 %v2928_v26 }
  0xef   :  { %v2277_v53 = vpop.f32.mrb[0].mxu0 }
  0xf0   :  { %v340_v54 = vadd.f32 %v2277_v53, %v1986_v50  ;;  %v321_v55 = vpop.f32.mrb[1].mxu0  ;;  %v2026_v53 = vld [vmem:[%s3501_s4 + $0x150] sm:$0xff] }
  0xf1   :  { %v339_v56 = vadd.f32 %v1986_v50, %v321_v55  ;;  %v2025_v50 = vld [vmem:[%s3501_s4 + $0x148] sm:$0xff] }
  0xf2   :  { %v3130_v58 = vmax.f32 %v340_v54, 0.0  ;;  %v2711_v51 = vpack.c.bf16 %v2025_v50, %v2024_v48  ;;  %v2027_v54 = vld [vmem:[%s3501_s4 + $0x158] sm:$0xff]  ;;  %v2059_v50 = vld [vmem:[%s3504_s7] ss:$0 sm:$0xff] }
  0xf3   :  { %v3138_v61 = vmax.f32 %v339_v56, 0.0  ;;  %v2714_v56 = vpack.c.bf16 %v2027_v54, %v2026_v53  ;;  %v1695_v53 = vld [vmem:[%s3505_s8 + $0x8] sm:$0xff] }
  0xf4   :  { %2447 = vmatmul.mubr.msk.f32.vlgmr.msra.gmra.mrb[2].mxu0 %vm352_vm8, %v3130_v58  ;;  %v1083_v8 = vrot.slane %v3130_v58, 1  ;;  %v1157_v22 = vrot.slane %v3130_v58, 2  ;;  %v1231_v37 = vrot.slane %v3130_v58, 3  ;;  %v1305_v52 = vrot.slane %v3130_v58, 4 }
  0xf5   :  { %2760 = vmatpush3.bf16.msra.mxu0 %v2663_v57  ;;  %2295 = vmatmul.mubr.msk.f32.vlgmr.msra.gmra.mrb[0].mxu1 %vm352_vm8, %v3138_v61  ;;  %v436_v11 = vrot.slane %v3138_v61, 1  ;;  %v519_v25 = vrot.slane %v3138_v61, 2  ;;  %v602_v40 = vrot.slane %v3138_v61, 3  ;;  %v685_v55 = vrot.slane %v3138_v61, 4 }
  0xf6   :  { %2664 = vmatpush3.bf16.msra.mxu1 %v2663_v57  ;;  %2761 = vmatprep.subr.bf16.mxu0 %v2928_v26  ;;  %v2028_v57 = vld [vmem:[%s3501_s4 + $0x160] sm:$0xff]  ;;  %v934_v31 = vrot.slane %v3138_v61, 7 }
  0xf7   :  { %2665 = vmatprep.subr.bf16.mxu1 %v2928_v26  ;;  %2465 = vmatprep.mubr.msk.f32.mxu0 %vm2929_vm7, %v2930_v49  ;;  %v2717_v60 = vpack.c.bf16 %v2029_v59, %v2028_v57 }
  0xf8   :  { %2313 = vmatprep.mubr.msk.f32.mxu1 %vm2929_vm7, %v2930_v49 }
  0xf9   :  { %2763 = vmatpush3.bf16.msra.mxu0 %v2666_v62 }
  0xfa   :  { %2667 = vmatpush3.bf16.msra.mxu1 %v2666_v62  ;;  %2764 = vmatprep.subr.bf16.mxu0 %v2928_v26  ;;  %v2030_v62 = vld [vmem:[%s3501_s4 + $0x170] sm:$0xff] }
  0xfb   :  { %2668 = vmatprep.subr.bf16.mxu1 %v2928_v26  ;;  %v2720_v0 = vpack.c.bf16 %v2031_v63, %v2030_v62  ;;  %v1696_v63 = vld [vmem:[%s3505_s8 + $0x10] sm:$0xff] }
  0xfd   :  { %2766 = vmatpush3.bf16.msra.mxu0 %v2669_v1 }
  0xfe   :  { %2670 = vmatpush3.bf16.msra.mxu1 %v2669_v1  ;;  %2767 = vmatprep.subr.bf16.mxu0 %v2928_v26  ;;  %v2033_v1 = vld [vmem:[%s3501_s4 + $0x180] sm:$0xff] }
  0xff   :  { %2671 = vmatprep.subr.bf16.mxu1 %v2928_v26  ;;  %v2723_v3 = vpack.c.bf16 %v2034_v2, %v2033_v1  ;;  %v1858_v2 = vld [vmem:[%s3508_s11] sm:$0xff] }
 0x101   :  { %2769 = vmatpush3.bf16.msra.mxu0 %v2672_v4 }
 0x102   :  { %2673 = vmatpush3.bf16.msra.mxu1 %v2672_v4  ;;  %2770 = vmatprep.subr.bf16.mxu0 %v2928_v26  ;;  %v1379_v4 = vrot.slane %v3130_v58, 5 }
 0x103   :  { %2674 = vmatprep.subr.bf16.mxu1 %v2928_v26 }
 0x104   :  { %2466 = vmatmul.mubr.msk.f32.vlgmr.msra.gmra.mrb[2].mxu0 %vm352_vm8, %v1083_v8  ;;  %v2726_v8 = vpack.c.bf16 %v2036_v6, %v2035_v5  ;;  %v1860_v5 = vld [vmem:[%s3508_s11 + $0x10] sm:$0xff] }
 0x105   :  { %2314 = vmatmul.mubr.msk.f32.vlgmr.msra.gmra.mrb[0].mxu1 %vm352_vm8, %v436_v11  ;;  %2772 = vmatpush3.bf16.msra.mxu0 %v2675_v7  ;;  %v2729_v11 = vpack.c.bf16 %v2038_v10, %v2037_v9  ;;  %v2063_v10 = vld [vmem:[%s3507_s10] ss:$0 sm:$0xff]  ;;  %s2931_s10 = smov [#allocation2]  }
 0x106   :  { %2676 = vmatpush3.bf16.msra.mxu1 %v2675_v7  ;;  %2773 = vmatprep.subr.bf16.mxu0 %v2928_v26  ;;  %v768_v7 = vrot.slane %v3138_v61, 5 }
 0x107   :  { %2677 = vmatprep.subr.bf16.mxu1 %v2928_v26  ;;  %2484 = vmatprep.mubr.msk.f32.mxu0 %vm2929_vm7, %v2930_v49 }
 0x108   :  { %2332 = vmatprep.mubr.msk.f32.mxu1 %vm2929_vm7, %v2930_v49 }
 0x109   :  { %2775 = vmatpush3.bf16.msra.mxu0 %v2678_v12 }
 0x10a   :  { %2679 = vmatpush3.bf16.msra.mxu1 %v2678_v12  ;;  %2776 = vmatprep.subr.bf16.mxu0 %v2928_v26  ;;  %v2039_v12 = vld [vmem:[%s3501_s4 + $0x1b0] sm:$0xff] }
 0x10b   :  { %2680 = vmatprep.subr.bf16.mxu1 %v2928_v26  ;;  %v2732_v14 = vpack.c.bf16 %v2040_v13, %v2039_v12 }
 0x10d   :  { %2778 = vmatpush3.bf16.msra.mxu0 %v2681_v15 }
 0x10e   :  { %2682 = vmatpush3.bf16.msra.mxu1 %v2681_v15  ;;  %2779 = vmatprep.subr.bf16.mxu0 %v2928_v26  ;;  %v2042_v15 = vld [vmem:[%s3501_s4 + $0x1c0] sm:$0xff] }
 0x10f   :  { %2683 = vmatprep.subr.bf16.mxu1 %v2928_v26  ;;  %v2735_v17 = vpack.c.bf16 %v2043_v16, %v2042_v15 }
 0x111   :  { %2781 = vmatpush3.bf16.msra.mxu0 %v2684_v18 }
 0x112   :  { %2685 = vmatpush3.bf16.msra.mxu1 %v2684_v18  ;;  %2782 = vmatprep.subr.bf16.mxu0 %v2928_v26  ;;  %v1453_v18 = vrot.slane %v3130_v58, 6 }
 0x113   :  { %2686 = vmatprep.subr.bf16.mxu1 %v2928_v26 }
 0x114   :  { %2485 = vmatmul.mubr.msk.f32.vlgmr.msra.gmra.mrb[2].mxu0 %vm352_vm8, %v1157_v22  ;;  %v2738_v22 = vpack.c.bf16 %v2045_v20, %v2044_v19 }
 0x115   :  { %2333 = vmatmul.mubr.msk.f32.vlgmr.msra.gmra.mrb[0].mxu1 %vm352_vm8, %v519_v25  ;;  %2784 = vmatpush3.bf16.msra.mxu0 %v2687_v21  ;;  %v2741_v25 = vpack.c.bf16 %v2047_v24, %v2046_v23 }
 0x116   :  { %2688 = vmatpush3.bf16.msra.mxu1 %v2687_v21  ;;  %2785 = vmatprep.subr.bf16.mxu0 %v2928_v26  ;;  %v851_v21 = vrot.slane %v3138_v61, 6  ;;  %v1698_v61 = vld [vmem:[%s3506_s9] sm:$0xff] }
 0x117   :  { %2689 = vmatprep.subr.bf16.mxu1 %v2928_v26  ;;  %2503 = vmatprep.mubr.msk.f32.mxu0 %vm2929_vm7, %v2930_v49 }
 0x118   :  { %2351 = vmatprep.mubr.msk.f32.mxu1 %vm2929_vm7, %v2930_v49 }
 0x119   :  { %2787 = vmatpush3.bf16.msra.mxu0 %v2690_v27 }
 0x11a   :  { %2691 = vmatpush3.bf16.msra.mxu1 %v2690_v27  ;;  %2788 = vmatprep.subr.bf16.mxu0 %v2928_v26  ;;  %v2048_v27 = vld [vmem:[%s3501_s4 + $0x1f0] sm:$0xff] }
 0x11b   :  { %2692 = vmatprep.subr.bf16.mxu1 %v2928_v26  ;;  %v2744_v29 = vpack.c.bf16 %v2049_v28, %v2048_v27 }
 0x11d   :  { %2790 = vmatpush3.bf16.msra.mxu0 %v2693_v30 }
 0x11e   :  { %2694 = vmatpush3.bf16.msra.mxu1 %v2693_v30  ;;  %2791 = vmatprep.subr.bf16.mxu0 %v2928_v26  ;;  %v1527_v30 = vrot.slane %v3130_v58, 7  ;;  %v1610_v58 = vld [vmem:[%s3498_s1] sm:$0x3] }
 0x11f   :  { %2695 = vmatprep.subr.bf16.mxu1 %v2928_v26 }
 0x121   :  { %2793 = vmatpush3.bf16.msra.mxu0 %v2696_v33 }
 0x122   :  { %2697 = vmatpush3.bf16.msra.mxu1 %v2696_v33  ;;  %2794 = vmatprep.subr.bf16.mxu0 %v2928_v26  ;;  %v1699_v33 = vld [vmem:[%s3506_s9 + $0x8] sm:$0xff] }
 0x123   :  { %2698 = vmatprep.subr.bf16.mxu1 %v2928_v26  ;;  %v2843_v34 = vpack.c.bf16 %v1699_v33, %v1698_v61 }
 0x124   :  { %2504 = vmatmul.mubr.msk.f32.vlgmr.msra.gmra.mrb[2].mxu0 %vm352_vm8, %v1231_v37 }
 0x125   :  { %2352 = vmatmul.mubr.msk.f32.vlgmr.msra.gmra.mrb[0].mxu1 %vm352_vm8, %v602_v40  ;;  %2796 = vmatpush3.bf16.msra.mxu0 %v2699_v36  ;;  %v343_v40 = vld [vmem:[%s3502_s5] sm:$0x1] }
 0x126   :  { %2700 = vmatpush3.bf16.msra.mxu1 %v2699_v36  ;;  %2797 = vmatprep.subr.bf16.mxu0 %v2928_v26  ;;  %v1701_v36 = vld [vmem:[%s3506_s9 + $0x18] sm:$0xff] }
 0x127   :  { %2701 = vmatprep.subr.bf16.mxu1 %v2928_v26  ;;  %2522 = vmatprep.mubr.msk.f32.mxu0 %vm2929_vm7, %v2930_v49  ;;  %v2846_v37 = vpack.c.bf16 %v1701_v36, %v1700_v35 }
 0x128   :  { %2370 = vmatprep.mubr.msk.f32.mxu1 %vm2929_vm7, %v2930_v49 }
 0x129   :  { %2799 = vmatpush3.bf16.msra.mxu0 %v2702_v41 }
 0x12a   :  { %2703 = vmatpush3.bf16.msra.mxu1 %v2702_v41  ;;  %2800 = vmatprep.subr.bf16.mxu0 %v2928_v26 }
 0x12b   :  { %2704 = vmatprep.subr.bf16.mxu1 %v2928_v26 }
 0x12d   :  { %2802 = vmatpush3.bf16.msra.mxu0 %v2705_v44 }
 0x12e   :  { %2706 = vmatpush3.bf16.msra.mxu1 %v2705_v44  ;;  %2803 = vmatprep.subr.bf16.mxu0 %v2928_v26 }
 0x12f   :  { %2707 = vmatprep.subr.bf16.mxu1 %v2928_v26 }
 0x131   :  { %2805 = vmatpush3.bf16.msra.mxu0 %v2708_v47 }
 0x132   :  { %2709 = vmatpush3.bf16.msra.mxu1 %v2708_v47  ;;  %2806 = vmatprep.subr.bf16.mxu0 %v2928_v26 }
 0x133   :  { %2710 = vmatprep.subr.bf16.mxu1 %v2928_v26 }
 0x134   :  { %2523 = vmatmul.mubr.msk.f32.vlgmr.msra.gmra.mrb[2].mxu0 %vm352_vm8, %v1305_v52  ;;  %v1694_v52 = vld [vmem:[%s3505_s8] sm:$0xff] }
 0x135   :  { %2371 = vmatmul.mubr.msk.f32.vlgmr.msra.gmra.mrb[0].mxu1 %vm352_vm8, %v685_v55  ;;  %2808 = vmatpush3.bf16.msra.mxu0 %v2711_v51 }
 0x136   :  { %2712 = vmatpush3.bf16.msra.mxu1 %v2711_v51  ;;  %2809 = vmatprep.subr.bf16.mxu0 %v2928_v26 }
 0x137   :  { %2713 = vmatprep.subr.bf16.mxu1 %v2928_v26  ;;  %2541 = vmatprep.mubr.msk.f32.mxu0 %vm2929_vm7, %v2930_v49 }
 0x138   :  { %2389 = vmatprep.mubr.msk.f32.mxu1 %vm2929_vm7, %v2930_v49 }
 0x139   :  { %2811 = vmatpush3.bf16.msra.mxu0 %v2714_v56 }
 0x13a   :  { %2715 = vmatpush3.bf16.msra.mxu1 %v2714_v56  ;;  %2812 = vmatprep.subr.bf16.mxu0 %v2928_v26 }
 0x13b   :  { %2716 = vmatprep.subr.bf16.mxu1 %v2928_v26 }
 0x13d   :  { %2814 = vmatpush3.bf16.msra.mxu0 %v2717_v60 }
 0x13e   :  { %2718 = vmatpush3.bf16.msra.mxu1 %v2717_v60  ;;  %2815 = vmatprep.subr.bf16.mxu0 %v2928_v26  ;;  %v2849_v60 = vpack.c.bf16 %v1695_v53, %v1694_v52 }
 0x13f   :  { %2719 = vmatprep.subr.bf16.mxu1 %v2928_v26 }
 0x141   :  { %2817 = vmatpush3.bf16.msra.mxu0 %v2720_v0 }
 0x142   :  { %2721 = vmatpush3.bf16.msra.mxu1 %v2720_v0  ;;  %2818 = vmatprep.subr.bf16.mxu0 %v2928_v26  ;;  %v1697_v0 = vld [vmem:[%s3505_s8 + $0x18] sm:$0xff] }
 0x143   :  { %2722 = vmatprep.subr.bf16.mxu1 %v2928_v26  ;;  %v2852_v1 = vpack.c.bf16 %v1697_v0, %v1696_v63 }
 0x144   :  { %2542 = vmatmul.mubr.msk.f32.vlgmr.msra.gmra.mrb[2].mxu0 %vm352_vm8, %v1379_v4 }
 0x145   :  { %2390 = vmatmul.mubr.msk.f32.vlgmr.msra.gmra.mrb[0].mxu1 %vm352_vm8, %v768_v7  ;;  %2820 = vmatpush3.bf16.msra.mxu0 %v2723_v3 }
 0x146   :  { %2724 = vmatpush3.bf16.msra.mxu1 %v2723_v3  ;;  %2821 = vmatprep.subr.bf16.mxu0 %v2928_v26  ;;  %v1859_v3 = vld [vmem:[%s3508_s11 + $0x8] sm:$0xff] }
 0x147   :  { %2725 = vmatprep.subr.bf16.mxu1 %v2928_v26  ;;  %2560 = vmatprep.mubr.msk.f32.mxu0 %vm2929_vm7, %v2930_v49  ;;  %v2855_v4 = vpack.c.bf16 %v1859_v3, %v1858_v2 }
 0x148   :  { %2408 = vmatprep.mubr.msk.f32.mxu1 %vm2929_vm7, %v2930_v49 }
 0x149   :  { %2823 = vmatpush3.bf16.msra.mxu0 %v2726_v8 }
 0x14a   :  { %2727 = vmatpush3.bf16.msra.mxu1 %v2726_v8  ;;  %2824 = vmatprep.subr.bf16.mxu0 %v2928_v26 }
 0x14b   :  { %2728 = vmatprep.subr.bf16.mxu1 %v2928_v26 }
 0x14d   :  { %2826 = vmatpush3.bf16.msra.mxu0 %v2729_v11 }
 0x14e   :  { %2730 = vmatpush3.bf16.msra.mxu1 %v2729_v11  ;;  %2827 = vmatprep.subr.bf16.mxu0 %v2928_v26 }
 0x14f   :  { %2731 = vmatprep.subr.bf16.mxu1 %v2928_v26 }
 0x151   :  { %2829 = vmatpush3.bf16.msra.mxu0 %v2732_v14 }
 0x152   :  { %2733 = vmatpush3.bf16.msra.mxu1 %v2732_v14  ;;  %2830 = vmatprep.subr.bf16.mxu0 %v2928_v26  ;;  %v2064_v14 = vld [vmem:[%s3509_s12] ss:$0 sm:$0xff] }
 0x153   :  { %2734 = vmatprep.subr.bf16.mxu1 %v2928_v26 }
 0x154   :  { %2561 = vmatmul.mubr.msk.f32.vlgmr.msra.gmra.mrb[2].mxu0 %vm352_vm8, %v1453_v18 }
 0x155   :  { %2409 = vmatmul.mubr.msk.f32.vlgmr.msra.gmra.mrb[0].mxu1 %vm352_vm8, %v851_v21  ;;  %2832 = vmatpush3.bf16.msra.mxu0 %v2735_v17 }
 0x156   :  { %2736 = vmatpush3.bf16.msra.mxu1 %v2735_v17  ;;  %2833 = vmatprep.subr.bf16.mxu0 %v2928_v26 }
 0x157   :  { %2737 = vmatprep.subr.bf16.mxu1 %v2928_v26  ;;  %2579 = vmatprep.mubr.msk.f32.mxu0 %vm2929_vm7, %v2930_v49 }
 0x158   :  { %2427 = vmatprep.mubr.msk.f32.mxu1 %vm2929_vm7, %v2930_v49 }
 0x159   :  { %2835 = vmatpush3.bf16.msra.mxu0 %v2738_v22 }
 0x15a   :  { %2739 = vmatpush3.bf16.msra.mxu1 %v2738_v22  ;;  %2836 = vmatprep.subr.bf16.mxu0 %v2928_v26 }
 0x15b   :  { %2740 = vmatprep.subr.bf16.mxu1 %v2928_v26 }
 0x15d   :  { %2838 = vmatpush3.bf16.msra.mxu0 %v2741_v25 }
 0x15e   :  { %2742 = vmatpush3.bf16.msra.mxu1 %v2741_v25  ;;  %2839 = vmatprep.subr.bf16.mxu0 %v2928_v26 }
 0x15f   :  { %2743 = vmatprep.subr.bf16.mxu1 %v2928_v26 }
 0x161   :  { %2841 = vmatpush3.bf16.msra.mxu0 %v2744_v29 }
 0x162   :  { %2745 = vmatpush3.bf16.msra.mxu1 %v2744_v29 }
 0x163   :  { %2582 = vmatprep.subr.mxu1 %v2930_v49 }
 0x164   :  { %2580 = vmatmul.mubr.msk.f32.vlgmr.msra.gmra.mrb[2].mxu0 %vm352_vm8, %v1527_v30 }
 0x165   :  { %2428 = vmatmul.mubr.msk.f32.vlgmr.msra.gmra.mrb[0].mxu1 %vm352_vm8, %v934_v31 }
 0x166   :  { %2583 = vmatpush3.msra.mxu1 %v1611_v32  ;;  %2584 = vmatprep.mubr.msk.f32.mxu1 %vm2929_vm7, %v2930_v49 }
 0x167   :  { %2842 = vmatprep.subr.bf16.mxu1 %v2928_v26 }
 0x169   :  { %2585 = vmatmul.mubr.msk.f32.vlgmr.msra.gmra.mrb[2].mxu1 %vm1619_vm9, %v1610_v58 }
 0x16a   :  { %2595 = vmatprep.mubr.msk.f32.mxu1 %vm2929_vm7, %v2930_v49  ;;  %2844 = vmatpush3.bf16.msra.mxu1 %v2843_v34 }
 0x16b   :  { %2845 = vmatprep.subr.bf16.mxu1 %v2928_v26 }
 0x16e   :  { %2847 = vmatpush3.bf16.msra.mxu1 %v2846_v37 }
 0x16f   :  { %2848 = vmatprep.subr.bf16.mxu1 %v2928_v26 }
 0x237   :  { %v1596_v41 = vpop.f32.mrb[2].mxu0 }
 0x238   :  { %v2861_v42 = vadd.f32 %v1596_v41, %v343_v40  ;;  %v1003_v44 = vpop.f32.mrb[0].mxu1  ;;  %v2581_v45 = vpop.f32.mrb[3].mxu0 }
 0x239   :  { %v2860_v46 = vadd.f32 %v1003_v44, %v343_v40  ;;  %v2429_v47 = vpop.f32.mrb[1].mxu1 }
 0x23a   :  { %v1601_v48 = vmax.f32 %v2861_v42, 0.0 }
 0x23b   :  { %v1008_v51 = vmax.f32 %v2860_v46, 0.0 }
 0x23c   :  { %v1606_v54 = vrot.slane %v1601_v48, %v1605_v43  ;;  %v1689_v55 = vpop.f32.mrb[2].mxu1 }
 0x23d   :  { %v1690_v56 = vadd.f32 %v2059_v50, %v1689_v55  ;;  %v2586_v57 = vpop.f32.mrb[3].mxu1 }
 0x23e   :  { %v1609_v59 = vsel %vm1608_vm10, %v1008_v51, %v1606_v54 }
 0x23f   :  { %v1693_v62 = vmax.f32 %v1690_v56, 0.0 }
 0x241   :  { %2596 = vmatmul.mubr.msk.f32.vlgmr.msra.gmra.mrb[4].mxu1 %vm1702_vm11, %v1693_v62 }
 0x242   :  { %2850 = vmatpush3.bf16.msra.mxu1 %v2849_v60  ;;  %2606 = vmatprep.mubr.msk.f32.mxu1 %vm2929_vm7, %v2930_v49 }
 0x243   :  { %2851 = vmatprep.subr.bf16.mxu1 %v2928_v26 }
 0x246   :  { %2853 = vmatpush3.bf16.msra.mxu1 %v2852_v1 }
 0x247   :  { %2854 = vmatprep.subr.bf16.mxu1 %v2928_v26 }
 0x249   :  { %2607 = vmatmul.mubr.msk.f32.vlgmr.msra.gmra.mrb[6].mxu1 %vm1702_vm11, %v1609_v59 }
 0x24a   :  { %2617 = vmatprep.mubr.msk.f32.mxu1 %vm2929_vm7, %v2930_v49  ;;  %2856 = vmatpush3.bf16.msra.mxu1 %v2855_v4  ;;  %v1861_v49 = vld [vmem:[%s3508_s11 + $0x18] sm:$0xff]  ;;  %s1961_s11 = sshll.u32 %s2931_s10, 4  ;;  %s1962_s11 = int_to_ptr.vmem [resolvable:$true] %s1961_s11 }
 0x24b   :  { %2857 = vmatprep.subr.bf16.mxu1 %v2928_v26  ;;  %v2858_v6 = vpack.c.bf16 %v1861_v49, %v1860_v5  ;;  %s2903_s12 = scalar_lea.vmem %s1962_s11, 32  ;;  %p2908_p1 = scmp.lt.s32.totalorder %s1962_s11, %s1962_s11 }
 0x24c   :  { %p2904_p0 = scmp.ne.s32.totalorder %s1962_s11, %s2903_s12  ;;  %p2909_p2 = scmp.lt.s32.totalorder %s2903_s12, %s2903_s12 }
 0x24e   :  { %2859 = vmatpush3.bf16.msra.mxu1 %v2858_v6  ;;  %p2910_p3 = por %p2909_p2, %p2908_p1 }
 0x250   :  { %p2911_p4 = pnand %p2910_p3, %p2904_p0 }
 0x314   :  { %v1772_v7 = vpop.f32.mrb[4].mxu1 }
 0x315   :  { %v2597_v8 = vpop.f32.mrb[5].mxu1 }
 0x31c   :  { %v1845_v9 = vpop.f32.mrb[6].mxu1 }
 0x31d   :  { %v1846_v11 = vadd.f32 %v1845_v9, %v1772_v7  ;;  %v2608_v12 = vpop.f32.mrb[7].mxu1 }
 0x31f   :  { %v1856_v26 = vadd.f32 %v2063_v10, %v1846_v11 }
 0x321   :  { %v1857_v13 = vmax.f32 %v1856_v26, 0.0 }
 0x323   :  { %2618 = vmatmul.mubr.msk.f32.vlgmr.msra.gmra.mrb[8].mxu1 %vm1702_vm11, %v1857_v13 }
 0x3f6   :  { %v1938_v15 = vpop.f32.mrb[8].mxu1 }
 0x3f7   :  { %v1939_v16 = vadd.f32 %v2064_v14, %v1938_v15  ;;  %v2619_v17 = vpop.f32.mrb[9].mxu1 }
 0x3f9   :  { %v1943_v18 = vsel %vm1942_vm12, %v1939_v16, -inf }
 0x3fa   :  { %1944 = vmax.xlane.f32.xlu0 %v1943_v18 }
 0x487   :  { %v1945_v19 = vpop.xlane.xlu0 %1944 }
 0x488   :  { %v1946_v20 = vsub.f32 %v1939_v16, %v1945_v19 }
 0x48a   :  { %v1947_v21 = vmul.f32 1.442695, %v1946_v20 }
 0x48c   :  { %2899 = vpow2.f32 %v1947_v21 }
 0x496   :  { %v2900_v22 = vpop.eup %2899 }
 0x497   :  { %v1949_v23 = vsel %vm1942_vm12, %v2900_v22, 0.0 }
 0x498   :  { %1950 = vadd.xlane.f32.xlu0 %v1949_v23 }
 0x525   :  { %v1951_v24 = vpop.xlane.xlu0 %1950 }
 0x526   :  { %2901 = vrcp.f32 %v1951_v24 }
 0x530   :  { %v2902_v25 = vpop.eup %2901 }
 0x531   :  { %v1953_v27 = vmul.f32 %v2902_v25, %v2900_v22 }
 0x533   :  { %1954 = vst.msk [vmem:[#allocation2] sm:$0x3] %vm1942_vm12, %v1953_v27 }
 0x534   :  { %2914 = shalt.err (!%p2911_p4)
}
 0x535   :  { %s2915_s19 = scalar_lea.hbm %s3510_s13, 32 }
 0x536   :  { %p2916_p5 = scmp.ne.s32.totalorder %s3510_s13, %s2915_s19  ;;  %p2919_p6 = scmp.lt.u32.totalorder %s2915_s19, %s3510_s13 }
 0x538   :  { %p2921_p7 = pnand %p2919_p6, %p2916_p5 }
 0x53a   :  { %2924 = shalt.err (!%p2921_p7)
}
 0x53b   :  { %1964 = dma.vmem_to_hbm [thread:$0]  %s1962_s11, 32, %s3510_s13, [#allocation3]  }
 0x53c   :  { %2925 = dma.done.wait [#allocation3], 32  }
 0x53d   :  { %2926 = vsyncadd [#allocation3], 4294967264 }
 0x53e   :  { %1968 = vsyncpa [#allocation3], 1 }

</bundles_post_ra>
